<compile_context>
chip_gen: v7x
topology: tpu7x:2x2x1
jax: 0.10.0
libtpu: 0.0.40
codegen_flags: <defaults>
</compile_context>

<pallas_src>
import jax
import jax.numpy as jnp
from jax import lax
from jax.experimental import pallas as pl
from jax.experimental.pallas import tpu as pltpu


def _scalar_encoder_kernel(xp_ref, quad_ref, mw_ref, mb_ref, beta_ref, o_ref):
    """One grid step.

    xp_ref:   (tile_rows, P)  packed scalars: xp[r, g] = x[r*P + g]
    quad_ref: (3, P)          rows = A, B, C+eps (broadcast across P)
    mw_ref:   (P, W)          row g = tiled (w-mean w)*gamma, nonzero only on group-g lanes
    mb_ref:   (P, W)          row g = tiled k*(b-mean b)*gamma, masked the same way
    beta_ref: (1, W)          tiled LayerNorm bias
    o_ref:    (tile_rows, W)  packed output; lane j of row r = y[r*P + j//H, j%H]
    """
    xp = xp_ref[...]                       # (tile_rows, P)
    quad = quad_ref[...]                   # (3, P)
    a = quad[0:1, :]
    bq = quad[1:2, :]
    c = quad[2:3, :]

    # inv = 1/sqrt(var + eps) with var = A*x^2 + B*x + C (closed-form LayerNorm stats).
    inv = lax.rsqrt((a * xp + bq) * xp + c)    # (tile_rows, P)
    s = xp * inv                               # (tile_rows, P)

    mw = mw_ref[...]                           # (P, W)
    mb = mb_ref[...]                           # (P, W)
    P = xp.shape[-1]

    y = beta_ref[...]                          # (1, W) → broadcasts to (tile_rows, W)
    for g in range(P):                         # unrolled at trace time (P is static)
        y = y + s[:, g:g + 1] * mw[g:g + 1, :] + inv[:, g:g + 1] * mb[g:g + 1, :]

    o_ref[...] = y.astype(o_ref.dtype)


def _round_up(v, m):
    return ((v + m - 1) // m) * m


def scalar_encoder_forward(x, w, b, gamma, beta, *, k, eps=1e-15,
                           tile_rows=None, out_dtype=jnp.float32):
    """x: (N, 1) f32; w, b, gamma, beta: (1, H) f32. Returns (N, H)."""
    x = jnp.asarray(x, jnp.float32).reshape(-1, 1)
    N = x.shape[0]
    H = w.shape[-1]
    w = jnp.asarray(w, jnp.float32).reshape(1, H)
    b = jnp.asarray(b, jnp.float32).reshape(1, H)
    gamma = jnp.asarray(gamma, jnp.float32).reshape(1, H)
    beta = jnp.asarray(beta, jnp.float32).reshape(1, H)

    # ---- host-side closed-form LayerNorm constants (tiny, computed once) ----
    wc = w - jnp.mean(w)
    bc = k * (b - jnp.mean(b))
    A = jnp.mean(wc * wc)
    B = 2.0 * jnp.mean(wc * bc)
    C = jnp.mean(bc * bc)
    dw = wc * gamma                       # (1, H)
    db = bc * gamma                       # (1, H)

    # ---- lane packing: P consecutive rows share one 128-wide lane row ----
    P = 128 // H if (H <= 128 and 128 % H == 0) else 1
    W = P * H

    dw_t = jnp.tile(dw, (1, P))           # (1, W)
    db_t = jnp.tile(db, (1, P))
    beta_t = jnp.tile(beta, (1, P))
    group = jnp.arange(W, dtype=jnp.int32) // H
    sel = (group[None, :] == jnp.arange(P, dtype=jnp.int32)[:, None]).astype(jnp.float32)
    mw = sel * dw_t                       # (P, W)
    mb = sel * db_t                       # (P, W)
    abc = jnp.stack([A, B, C + eps]).astype(jnp.float32)   # (3,)
    quad = jnp.broadcast_to(abc[:, None], (3, P))

    # ---- tiling over packed rows; remainder handled by zero padding ----
    rows = pl.cdiv(N, P)
    if tile_rows is None:
        tile_rows = min(4096, _round_up(rows, 8))   # big tiles; ≤ ~2 MiB output / step
    tile_rows = max(8, _round_up(tile_rows, 8))
    grid_n = pl.cdiv(rows, tile_rows)
    rows_pad = grid_n * tile_rows
    n_pad = rows_pad * P

    x_flat = jnp.pad(x.reshape(-1), (0, n_pad - N))
    xp = x_flat.reshape(rows_pad, P)

    out_packed = pl.pallas_call(
        _scalar_encoder_kernel,
        out_shape=jax.ShapeDtypeStruct((rows_pad, W), out_dtype),
        grid_spec=pltpu.PrefetchScalarGridSpec(
            num_scalar_prefetch=0,
            grid=(grid_n,),
            in_specs=[
                pl.BlockSpec((tile_rows, P), lambda i: (i, 0)),   # packed x
                pl.BlockSpec((3, P), lambda i: (0, 0)),           # A, B, C+eps
                pl.BlockSpec((P, W), lambda i: (0, 0)),           # masked dw rows
                pl.BlockSpec((P, W), lambda i: (0, 0)),           # masked db rows
                pl.BlockSpec((1, W), lambda i: (0, 0)),           # beta (tiled)
            ],
            out_specs=pl.BlockSpec((tile_rows, W), lambda i: (i, 0)),
        ),
        compiler_params=pltpu.CompilerParams(
            dimension_semantics=("parallel",),
        ),
    )(xp, quad, mw, mb, beta_t)

    # (rows_pad, P*H) row-major == (rows_pad*P, H) row-major: free view, then drop padding.
    return out_packed.reshape(rows_pad * P, H)[:N]


def scalar_encoder_reference(x, w, b, gamma, beta, *, k, eps=1e-15):
    z = x * w + k * b
    mean = jnp.mean(z, axis=-1, keepdims=True)
    var = jnp.mean((z - mean) ** 2, axis=-1, keepdims=True)
    return (z - mean) / jnp.sqrt(var + eps) * gamma + beta


if __name__ == "__main__":
    hidden_dim = 32
    k = 3.0

    key = jax.random.PRNGKey(0)
    kx, kw, kb = jax.random.split(key, 3)

    # torch.rand-style parameter init; LayerNorm affine defaults (ones / zeros).
    w = jax.random.uniform(kw, (1, hidden_dim), dtype=jnp.float32)
    b = jax.random.uniform(kb, (1, hidden_dim), dtype=jnp.float32)
    gamma = jnp.ones((1, hidden_dim), dtype=jnp.float32)
    beta = jnp.zeros((1, hidden_dim), dtype=jnp.float32)

    # (N, tile_rows) cases: tiny, N not a multiple of the lane-pack factor, multi-step grid.
    for n, tr in ((16, None), (53, None), (80, 8)):
        x = jax.random.normal(jax.random.fold_in(kx, n), (n, 1), dtype=jnp.float32)
        out = scalar_encoder_forward(x, w, b, gamma, beta, k=k, tile_rows=tr)
        out = jax.block_until_ready(out)
        ref = scalar_encoder_reference(x, w, b, gamma, beta, k=k)
        assert out.shape == (n, hidden_dim)
        assert jnp.allclose(out, ref, atol=1e-4, rtol=1e-4), (
            n, float(jnp.max(jnp.abs(out - ref))))

    print("KERNEL_OK")
</pallas_src>

<mosaic_0001>
module attributes {stable_mosaic.version = 11 : i64} {
  func.func @_scalar_encoder_kernel(%arg0: i32, %arg1: memref<8x4xf32, #tpu.memory_space<vmem>>, %arg2: memref<3x4xf32, #tpu.memory_space<vmem>>, %arg3: memref<4x128xf32, #tpu.memory_space<vmem>>, %arg4: memref<4x128xf32, #tpu.memory_space<vmem>>, %arg5: memref<1x128xf32, #tpu.memory_space<vmem>>, %arg6: memref<8x128xf32, #tpu.memory_space<vmem>>) attributes {dimension_semantics = [#tpu.dimension_semantics<parallel>], iteration_bounds = array<i64: 1>, scalar_prefetch = 0 : i64, scratch_operands = 0 : i64, tpu.core_type = #tpu.core_type<tc>, window_params = [{transform_indices = @transform_0, window_bounds = array<i64: 8, 4>}, {pipeline_mode = #tpu.pipeline_mode<synchronous>, transform_indices = @transform_1, window_bounds = array<i64: 3, 4>}, {pipeline_mode = #tpu.pipeline_mode<synchronous>, transform_indices = @transform_2, window_bounds = array<i64: 4, 128>}, {pipeline_mode = #tpu.pipeline_mode<synchronous>, transform_indices = @transform_3, window_bounds = array<i64: 4, 128>}, {pipeline_mode = #tpu.pipeline_mode<synchronous>, transform_indices = @transform_4, window_bounds = array<i64: 1, 128>}, {transform_indices = @transform_5, window_bounds = array<i64: 8, 128>}]} {
    %c0 = arith.constant 0 : index
    %c0_0 = arith.constant 0 : index
    %0 = vector.load %arg1[%c0, %c0_0] : memref<8x4xf32, #tpu.memory_space<vmem>>, vector<8x4xf32>
    %c0_1 = arith.constant 0 : index
    %c0_2 = arith.constant 0 : index
    %1 = vector.load %arg2[%c0_1, %c0_2] : memref<3x4xf32, #tpu.memory_space<vmem>>, vector<3x4xf32>
    %2 = vector.extract_strided_slice %1 {offsets = [0, 0], sizes = [1, 4], strides = [1, 1]} : vector<3x4xf32> to vector<1x4xf32>
    %3 = vector.extract_strided_slice %1 {offsets = [1, 0], sizes = [1, 4], strides = [1, 1]} : vector<3x4xf32> to vector<1x4xf32>
    %4 = vector.extract_strided_slice %1 {offsets = [2, 0], sizes = [1, 4], strides = [1, 1]} : vector<3x4xf32> to vector<1x4xf32>
    %5 = vector.broadcast %2 : vector<1x4xf32> to vector<8x4xf32>
    %6 = arith.mulf %5, %0 : vector<8x4xf32>
    %7 = vector.broadcast %3 : vector<1x4xf32> to vector<8x4xf32>
    %8 = arith.addf %6, %7 : vector<8x4xf32>
    %9 = arith.mulf %8, %0 : vector<8x4xf32>
    %10 = vector.broadcast %4 : vector<1x4xf32> to vector<8x4xf32>
    %11 = arith.addf %9, %10 : vector<8x4xf32>
    %12 = math.rsqrt %11 : vector<8x4xf32>
    %13 = arith.mulf %0, %12 : vector<8x4xf32>
    %c0_3 = arith.constant 0 : index
    %c0_4 = arith.constant 0 : index
    %14 = vector.load %arg3[%c0_3, %c0_4] : memref<4x128xf32, #tpu.memory_space<vmem>>, vector<4x128xf32>
    %c0_5 = arith.constant 0 : index
    %c0_6 = arith.constant 0 : index
    %15 = vector.load %arg4[%c0_5, %c0_6] : memref<4x128xf32, #tpu.memory_space<vmem>>, vector<4x128xf32>
    %c0_7 = arith.constant 0 : index
    %c0_8 = arith.constant 0 : index
    %16 = vector.load %arg5[%c0_7, %c0_8] : memref<1x128xf32, #tpu.memory_space<vmem>>, vector<1x128xf32>
    %17 = vector.extract_strided_slice %13 {offsets = [0, 0], sizes = [8, 1], strides = [1, 1]} : vector<8x4xf32> to vector<8x1xf32>
    %18 = vector.extract_strided_slice %14 {offsets = [0, 0], sizes = [1, 128], strides = [1, 1]} : vector<4x128xf32> to vector<1x128xf32>
    %19 = vector.broadcast %17 : vector<8x1xf32> to vector<8x128xf32>
    %20 = vector.broadcast %18 : vector<1x128xf32> to vector<8x128xf32>
    %21 = arith.mulf %19, %20 : vector<8x128xf32>
    %22 = vector.broadcast %16 : vector<1x128xf32> to vector<8x128xf32>
    %23 = arith.addf %22, %21 : vector<8x128xf32>
    %24 = vector.extract_strided_slice %12 {offsets = [0, 0], sizes = [8, 1], strides = [1, 1]} : vector<8x4xf32> to vector<8x1xf32>
    %25 = vector.extract_strided_slice %15 {offsets = [0, 0], sizes = [1, 128], strides = [1, 1]} : vector<4x128xf32> to vector<1x128xf32>
    %26 = vector.broadcast %24 : vector<8x1xf32> to vector<8x128xf32>
    %27 = vector.broadcast %25 : vector<1x128xf32> to vector<8x128xf32>
    %28 = arith.mulf %26, %27 : vector<8x128xf32>
    %29 = arith.addf %23, %28 : vector<8x128xf32>
    %30 = vector.extract_strided_slice %13 {offsets = [0, 1], sizes = [8, 1], strides = [1, 1]} : vector<8x4xf32> to vector<8x1xf32>
    %31 = vector.extract_strided_slice %14 {offsets = [1, 0], sizes = [1, 128], strides = [1, 1]} : vector<4x128xf32> to vector<1x128xf32>
    %32 = vector.broadcast %30 : vector<8x1xf32> to vector<8x128xf32>
    %33 = vector.broadcast %31 : vector<1x128xf32> to vector<8x128xf32>
    %34 = arith.mulf %32, %33 : vector<8x128xf32>
    %35 = arith.addf %29, %34 : vector<8x128xf32>
    %36 = vector.extract_strided_slice %12 {offsets = [0, 1], sizes = [8, 1], strides = [1, 1]} : vector<8x4xf32> to vector<8x1xf32>
    %37 = vector.extract_strided_slice %15 {offsets = [1, 0], sizes = [1, 128], strides = [1, 1]} : vector<4x128xf32> to vector<1x128xf32>
    %38 = vector.broadcast %36 : vector<8x1xf32> to vector<8x128xf32>
    %39 = vector.broadcast %37 : vector<1x128xf32> to vector<8x128xf32>
    %40 = arith.mulf %38, %39 : vector<8x128xf32>
    %41 = arith.addf %35, %40 : vector<8x128xf32>
    %42 = vector.extract_strided_slice %13 {offsets = [0, 2], sizes = [8, 1], strides = [1, 1]} : vector<8x4xf32> to vector<8x1xf32>
    %43 = vector.extract_strided_slice %14 {offsets = [2, 0], sizes = [1, 128], strides = [1, 1]} : vector<4x128xf32> to vector<1x128xf32>
    %44 = vector.broadcast %42 : vector<8x1xf32> to vector<8x128xf32>
    %45 = vector.broadcast %43 : vector<1x128xf32> to vector<8x128xf32>
    %46 = arith.mulf %44, %45 : vector<8x128xf32>
    %47 = arith.addf %41, %46 : vector<8x128xf32>
    %48 = vector.extract_strided_slice %12 {offsets = [0, 2], sizes = [8, 1], strides = [1, 1]} : vector<8x4xf32> to vector<8x1xf32>
    %49 = vector.extract_strided_slice %15 {offsets = [2, 0], sizes = [1, 128], strides = [1, 1]} : vector<4x128xf32> to vector<1x128xf32>
    %50 = vector.broadcast %48 : vector<8x1xf32> to vector<8x128xf32>
    %51 = vector.broadcast %49 : vector<1x128xf32> to vector<8x128xf32>
    %52 = arith.mulf %50, %51 : vector<8x128xf32>
    %53 = arith.addf %47, %52 : vector<8x128xf32>
    %54 = vector.extract_strided_slice %13 {offsets = [0, 3], sizes = [8, 1], strides = [1, 1]} : vector<8x4xf32> to vector<8x1xf32>
    %55 = vector.extract_strided_slice %14 {offsets = [3, 0], sizes = [1, 128], strides = [1, 1]} : vector<4x128xf32> to vector<1x128xf32>
    %56 = vector.broadcast %54 : vector<8x1xf32> to vector<8x128xf32>
    %57 = vector.broadcast %55 : vector<1x128xf32> to vector<8x128xf32>
    %58 = arith.mulf %56, %57 : vector<8x128xf32>
    %59 = arith.addf %53, %58 : vector<8x128xf32>
    %60 = vector.extract_strided_slice %12 {offsets = [0, 3], sizes = [8, 1], strides = [1, 1]} : vector<8x4xf32> to vector<8x1xf32>
    %61 = vector.extract_strided_slice %15 {offsets = [3, 0], sizes = [1, 128], strides = [1, 1]} : vector<4x128xf32> to vector<1x128xf32>
    %62 = vector.broadcast %60 : vector<8x1xf32> to vector<8x128xf32>
    %63 = vector.broadcast %61 : vector<1x128xf32> to vector<8x128xf32>
    %64 = arith.mulf %62, %63 : vector<8x128xf32>
    %65 = arith.addf %59, %64 : vector<8x128xf32>
    %c0_9 = arith.constant 0 : index
    %c0_10 = arith.constant 0 : index
    %66 = vector.load %arg6[%c0_9, %c0_10] : memref<8x128xf32, #tpu.memory_space<vmem>>, vector<8x128xf32>
    tpu.vector_store %arg6[%c0_9, %c0_10], %65 {strides = array<i32>} : memref<8x128xf32, #tpu.memory_space<vmem>>, vector<8x128xf32>,
    return
  }
  func.func @transform_0(%arg0: i32) -> (i32, i32) {
    %c0_i32 = arith.constant 0 : i32
    %c0_i32_0 = arith.constant 0 : i32
    return %arg0, %c0_i32 : i32, i32
  }
  func.func @transform_1(%arg0: i32) -> (i32, i32) {
    %c0_i32 = arith.constant 0 : i32
    %c0_i32_0 = arith.constant 0 : i32
    %c0_i32_1 = arith.constant 0 : i32
    return %c0_i32, %c0_i32_0 : i32, i32
  }
  func.func @transform_2(%arg0: i32) -> (i32, i32) {
    %c0_i32 = arith.constant 0 : i32
    %c0_i32_0 = arith.constant 0 : i32
    %c0_i32_1 = arith.constant 0 : i32
    return %c0_i32, %c0_i32_0 : i32, i32
  }
  func.func @transform_3(%arg0: i32) -> (i32, i32) {
    %c0_i32 = arith.constant 0 : i32
    %c0_i32_0 = arith.constant 0 : i32
    %c0_i32_1 = arith.constant 0 : i32
    return %c0_i32, %c0_i32_0 : i32, i32
  }
  func.func @transform_4(%arg0: i32) -> (i32, i32) {
    %c0_i32 = arith.constant 0 : i32
    %c0_i32_0 = arith.constant 0 : i32
    %c0_i32_1 = arith.constant 0 : i32
    return %c0_i32, %c0_i32_0 : i32, i32
  }
  func.func @transform_5(%arg0: i32) -> (i32, i32) {
    %c0_i32 = arith.constant 0 : i32
    %c0_i32_0 = arith.constant 0 : i32
    return %arg0, %c0_i32 : i32, i32
  }
}

</mosaic_0001>

<bundles_post_ra>
// kernel: tpu_custom_call.1
= control target key start
LH: loop header
LB: loop body
LE: loop exit
PB: predicated region body
PF: predicated region fallthrough
CT: control target
= control target key end

     0   :  { %v23_v0 = vlaneseq  ;;  %v185_v1 = vmov 1   ;;  %v186_v2 = vmov 0   ;;  %s247_s0 = inlined_call_operand.vmem [shape: f32[8,4], index: 0, kind: input, shape index: {}]   ;;  %s248_s1 = inlined_call_operand.vmem [shape: f32[3,4], index: 1, kind: input, shape index: {}]   ;;  %s249_s2 = inlined_call_operand.vmem [shape: f32[4,128], index: 2, kind: input, shape index: {}]   ;;  %s250_s3 = inlined_call_operand.vmem [shape: f32[4,128], index: 3, kind: input, shape index: {}]   ;;  %s251_s4 = inlined_call_operand.vmem [shape: f32[1,128], index: 4, kind: input, shape index: {}]   ;;  %s252_s5 = inlined_call_operand.hbm [shape: f32[8,128], index: 5, kind: output, shape index: {}]  }
   0x1   :  { %154 = vset.pattern.permute.xlu1 %v185_v1  ;;  %153 = vset.pattern.permute.xlu0 %v186_v2 }
   0x2   :  { %10 = vsyncpa [#allocation3], 0  ;;  %v24_v3 = vshrl.u32 %v23_v0, 7  ;;  %v22_v4 = vld [vmem:[%s248_s1] sm:$0x7]  ;;  %v187_v18 = vmov 2  }
   0x3   :  { %v21_v7 = vld [vmem:[%s247_s0] sm:$0xff]  ;;  %v188_v19 = vmov 3  }
   0x4   :  { %v25_v5 = vsub.s32 0, %v24_v3  ;;  %v30_v6 = vsub.s32 1, %v24_v3  ;;  %v36_v10 = vsub.s32 2, %v24_v3  ;;  %v41_v20 = vld [vmem:[%s249_s2] sm:$0xf]  ;;  %v118_v35 = vsub.s32 3, %v24_v3 }
   0x5   :  { %v42_v21 = vld [vmem:[%s250_s3] sm:$0xf]  ;;  %s189_s2 = smov [#allocation2]  }
   0x6   :  { %v26_v8 = vrot.slane %v22_v4, %v25_v5  ;;  %v31_v9 = vrot.slane %v22_v4, %v30_v6  ;;  %v37_v13 = vrot.slane %v22_v4, %v36_v10  ;;  %v52_v24 = vrot.slane %v41_v20, %v25_v5  ;;  %v147_v26 = vld [vmem:[%s251_s4] ss:$0 sm:$0xff]  ;;  %s139_s3 = sshll.u32 %s189_s2, 4  ;;  %s140_s3 = int_to_ptr.vmem [resolvable:$true] %s139_s3 }
   0x7   :  { %v69_v25 = vrot.slane %v42_v21, %v25_v5  ;;  %v79_v28 = vrot.slane %v41_v20, %v30_v6  ;;  %v89_v31 = vrot.slane %v42_v21, %v30_v6  ;;  %v99_v34 = vrot.slane %v41_v20, %v36_v10  ;;  %s161_s4 = scalar_lea.vmem %s140_s3, 128  ;;  %p166_p1 = scmp.lt.s32.totalorder %s140_s3, %s140_s3 }
   0x8   :  { %v27_v11 = vmul.f32 %v26_v8, %v21_v7  ;;  %v109_v40 = vrot.slane %v42_v21, %v36_v10  ;;  %v119_v44 = vrot.slane %v41_v20, %v118_v35  ;;  %v129_v46 = vrot.slane %v42_v21, %v118_v35  ;;  %p162_p0 = scmp.ne.s32.totalorder %s140_s3, %s161_s4  ;;  %p167_p2 = scmp.lt.s32.totalorder %s161_s4, %s161_s4 }
   0xa   :  { %v32_v12 = vadd.f32 %v31_v9, %v27_v11  ;;  %p168_p3 = por %p167_p2, %p166_p1 }
   0xc   :  { %v33_v14 = vmul.f32 %v32_v12, %v21_v7  ;;  %p169_p4 = pnand %p168_p3, %p162_p0 }
   0xe   :  { %v38_v15 = vadd.f32 %v37_v13, %v33_v14 }
  0x10   :  { %159 = vrsqrt.f32 %v38_v15 }
  0x1a   :  { %v160_v16 = vpop.eup %159 }
  0x1b   :  { %83 = vperm.xlu1 %154, %v160_v16   ;;  %63 = vperm.xlu0 %153, %v160_v16   ;;  %v40_v17 = vmul.f32 %v160_v16, %v21_v7 }
  0x1f   :  { %73 = vperm.xlu1 %154, %v40_v17   ;;  %46 = vperm.xlu0 %153, %v40_v17  }
  0x23   :  { %155 = vset.pattern.permute.xlu1 %v187_v18  ;;  %156 = vset.pattern.permute.xlu0 %v187_v18 }
  0x24   :  { %103 = vperm.xlu1 %155, %v160_v16   ;;  %93 = vperm.xlu0 %156, %v40_v17  }
  0x28   :  { %157 = vset.pattern.permute.xlu1 %v188_v19  ;;  %158 = vset.pattern.permute.xlu0 %v188_v19 }
  0x29   :  { %113 = vperm.xlu1 %157, %v40_v17   ;;  %123 = vperm.xlu0 %158, %v160_v16  }
  0x9a   :  { %v84_v22 = vpop.permute.xlu1 %83  ;;  %v64_v23 = vpop.permute.xlu0 %63 }
  0x9b   :  { %v70_v32 = vmul.f32 %v69_v25, %v64_v23  ;;  %v90_v41 = vmul.f32 %v89_v31, %v84_v22 }
  0x9e   :  { %v47_v27 = vpop.permute.xlu0 %46  ;;  %v74_v29 = vpop.permute.xlu1 %73 }
  0x9f   :  { %v53_v30 = vmul.f32 %v52_v24, %v47_v27  ;;  %v80_v36 = vmul.f32 %v79_v28, %v74_v29 }
  0xa1   :  { %v60_v33 = vadd.f32 %v147_v26, %v53_v30 }
  0xa3   :  { %v71_v37 = vadd.f32 %v70_v32, %v60_v33  ;;  %v104_v38 = vpop.permute.xlu1 %103  ;;  %v94_v39 = vpop.permute.xlu0 %93 }
  0xa4   :  { %v100_v43 = vmul.f32 %v99_v34, %v94_v39  ;;  %v110_v49 = vmul.f32 %v109_v40, %v104_v38 }
  0xa5   :  { %v81_v42 = vadd.f32 %v80_v36, %v71_v37 }
  0xa7   :  { %v91_v45 = vadd.f32 %v90_v41, %v81_v42 }
  0xa8   :  { %v114_v47 = vpop.permute.xlu1 %113  ;;  %v124_v48 = vpop.permute.xlu0 %123 }
  0xa9   :  { %v101_v50 = vadd.f32 %v100_v43, %v91_v45  ;;  %v120_v51 = vmul.f32 %v119_v44, %v114_v47  ;;  %v130_v53 = vmul.f32 %v129_v46, %v124_v48 }
  0xab   :  { %v111_v52 = vadd.f32 %v110_v49, %v101_v50 }
  0xad   :  { %v121_v54 = vadd.f32 %v120_v51, %v111_v52 }
  0xaf   :  { %v131_v55 = vadd.f32 %v130_v53, %v121_v54 }
  0xb1   :  { %132 = vst [vmem:[#allocation2] sm:$0xff] %v131_v55 }
  0xb2   :  { %172 = shalt.err (!%p169_p4)
}
  0xb3   :  { %s173_s28 = scalar_lea.hbm %s252_s5, 128 }
  0xb4   :  { %p174_p5 = scmp.ne.s32.totalorder %s252_s5, %s173_s28  ;;  %p177_p6 = scmp.lt.u32.totalorder %s173_s28, %s252_s5 }
  0xb6   :  { %p179_p7 = pnand %p177_p6, %p174_p5 }
  0xb8   :  { %182 = shalt.err (!%p179_p7)
}
  0xb9   :  { %142 = dma.vmem_to_hbm [thread:$0]  %s140_s3, 128, %s252_s5, [#allocation3]  }
  0xba   :  { %183 = dma.done.wait [#allocation3], 128  }
  0xbb   :  { %184 = vsyncadd [#allocation3], 4294967168 }
  0xbc   :  { %146 = vsyncpa [#allocation3], 1 }

</bundles_post_ra>
